<compile_context>
chip_gen: v5e
topology: v5e:2x2
jax: 0.10.0
libtpu: 0.0.40
codegen_flags: <defaults>
</compile_context>

<pallas_src>
import functools

import jax
import jax.numpy as jnp
from jax import lax
from jax.experimental import pallas as pl
from jax.experimental.pallas import tpu as pltpu


def _round_up(n, m):
    return ((n + m - 1) // m) * m


def _cdiv(a, b):
    return -(-a // b)


def _mlp_kernel(x_ref, w1_ref, b1_ref, w2_ref, b2_ref, w3_ref, b3_ref, o_ref,
                *, sub, n_chunks):
    # Resident (constant-index-map) weights/biases: load once per grid step.
    w1 = w1_ref[...]
    b1 = b1_ref[...]
    w2 = w2_ref[...]
    b2 = b2_ref[...]
    w3 = w3_ref[...]
    b3 = b3_ref[...]

    def do_chunk(row_start):
        # Cast the f32 activation stream to bf16 on the VPU right before the MXU.
        x = x_ref[pl.ds(row_start, sub), :].astype(jnp.bfloat16)
        # Layer 1: Linear + ReLU (f32 accumulation, f32 elementwise)
        h1 = jnp.dot(x, w1, preferred_element_type=jnp.float32)
        h1 = jnp.maximum(h1 + b1, 0.0)
        # Layer 2: Linear + ReLU
        h2 = jnp.dot(h1.astype(jnp.bfloat16), w2, preferred_element_type=jnp.float32)
        h2 = jnp.maximum(h2 + b2, 0.0)
        # Output layer: Linear (raw logits)
        out = jnp.dot(h2.astype(jnp.bfloat16), w3, preferred_element_type=jnp.float32) + b3
        o_ref[pl.ds(row_start, sub), :] = out.astype(o_ref.dtype)

    if n_chunks == 1:
        do_chunk(0)
    else:
        # Sub-chunk the batch tile so (sub, 128) f32 intermediates stay in-register
        # instead of spilling to VMEM at large TB.
        @pl.loop(0, n_chunks)
        def _(c):
            do_chunk(pl.multiple_of(c * sub, sub))


def _choose_tile(B, block_b):
    """Pick (TB, SUB) so padding < one tile, TB amortizes step overhead, and the
    grid keeps >= 2 steps for v7x megacore when the batch is large."""
    n_tiles = max(1, _cdiv(B, block_b))
    if n_tiles == 1 and B >= 1024:
        n_tiles = 2  # keep both v7x TensorCores busy + allow DMA pipelining
    tb = _cdiv(B, n_tiles)
    if tb >= 512:
        sub = 256
        tb = _round_up(tb, sub)
    else:
        tb = _round_up(tb, 8)
        sub = tb
    return tb, sub


@functools.partial(jax.jit, static_argnames=("block_b",))
def classifier_forward(x, params, block_b=4096):
    """Fused 3-layer MLP forward pass, batch-tiled Pallas kernel.

    x: (B, in_dim) float32
    params: dict with w1 (in_dim,h1), b1 (1,h1), w2 (h1,h2), b2 (1,h2),
            w3 (h2,out_dim), b3 (1,out_dim)   (weights stored input-major: y = x @ W + b)
    """
    # Weights are tiny (~20 KiB): cast them to bf16 once in the wrapper.
    # The activation stream x stays f32; the kernel casts per-tile (saves an HBM pass).
    w1 = params["w1"].astype(jnp.bfloat16)
    w2 = params["w2"].astype(jnp.bfloat16)
    w3 = params["w3"].astype(jnp.bfloat16)
    b1, b2, b3 = params["b1"], params["b2"], params["b3"]

    B, in_dim = x.shape
    h1_dim = w1.shape[1]
    h2_dim = w2.shape[1]
    out_dim = w3.shape[1]

    TB, SUB = _choose_tile(B, block_b)
    n_chunks = TB // SUB
    Bp = _round_up(B, TB)

    x_in = x
    if Bp != B:
        # TODO(synk): pad only the ragged tail tile instead of a full-array copy.
        x_in = jnp.pad(x_in, ((0, Bp - B), (0, 0)))

    grid = (Bp // TB,)

    # Weights/biases: full-array blocks with a constant index map -> pinned in VMEM.
    def resident_spec(a):
        return pl.BlockSpec(a.shape, lambda i: (0, 0))

    itemsize = jnp.dtype(jnp.float32).itemsize
    flops = 2 * Bp * (in_dim * h1_dim + h1_dim * h2_dim + h2_dim * out_dim)
    bytes_accessed = (
        Bp * in_dim * itemsize          # f32 x stream
        + Bp * out_dim * itemsize       # f32 logits
        + sum(int(p.size) * jnp.dtype(p.dtype).itemsize
              for p in (w1, b1, w2, b2, w3, b3))
    )

    kernel = functools.partial(_mlp_kernel, sub=SUB, n_chunks=n_chunks)

    out = pl.pallas_call(
        kernel,
        out_shape=jax.ShapeDtypeStruct((Bp, out_dim), x.dtype),
        grid=grid,
        in_specs=[
            pl.BlockSpec((TB, in_dim), lambda i: (i, 0)),
            resident_spec(w1), resident_spec(b1),
            resident_spec(w2), resident_spec(b2),
            resident_spec(w3), resident_spec(b3),
        ],
        out_specs=pl.BlockSpec((TB, out_dim), lambda i: (i, 0)),
        compiler_params=pltpu.CompilerParams(
            dimension_semantics=("parallel",)),
        cost_estimate=pl.CostEstimate(
            flops=flops, transcendentals=0, bytes_accessed=bytes_accessed),
    )(x_in, w1, b1, w2, b2, w3, b3)

    return out[:B] if Bp != B else out


def init_params(key, in_dim, out_dim, hiddens=(64, 128)):
    """Deterministic synthetic init (Kaiming-ish uniform like nn.Linear default)."""
    dims = [in_dim, *hiddens, out_dim]
    params = {}
    for i, (fan_in, fan_out) in enumerate(zip(dims[:-1], dims[1:]), start=1):
        key, kw, kb = jax.random.split(key, 3)
        bound = 1.0 / jnp.sqrt(fan_in)
        params[f"w{i}"] = jax.random.uniform(
            kw, (fan_in, fan_out), jnp.float32, -bound, bound)
        params[f"b{i}"] = jax.random.uniform(
            kb, (1, fan_out), jnp.float32, -bound, bound)
    return params


def reference_forward_f32(x, params):
    h = jnp.maximum(x @ params["w1"] + params["b1"], 0.0)
    h = jnp.maximum(h @ params["w2"] + params["b2"], 0.0)
    return h @ params["w3"] + params["b3"]


def reference_forward_bf16(x, params):
    """Mirrors the kernel's numerics: bf16 MXU operands, f32 accumulation.
    (Documented precision choice: hidden activations are re-cast to bf16 between layers.)"""
    bf = jnp.bfloat16
    h = jnp.dot(x.astype(bf), params["w1"].astype(bf),
                preferred_element_type=jnp.float32) + params["b1"]
    h = jnp.maximum(h, 0.0)
    h = jnp.dot(h.astype(bf), params["w2"].astype(bf),
                preferred_element_type=jnp.float32) + params["b2"]
    h = jnp.maximum(h, 0.0)
    return jnp.dot(h.astype(bf), params["w3"].astype(bf),
                   preferred_element_type=jnp.float32) + params["b3"]


def _check(out, x, params, tag):
    assert jnp.allclose(out, reference_forward_bf16(x, params),
                        atol=1e-4, rtol=1e-4), f"{tag}: mismatch vs bf16 reference"
    assert jnp.allclose(out, reference_forward_f32(x, params),
                        atol=5e-2, rtol=5e-2), f"{tag}: mismatch vs f32 reference"


if __name__ == "__main__":
    key = jax.random.PRNGKey(0)
    in_dim, out_dim = 32, 10
    params = init_params(key, in_dim, out_dim, hiddens=(64, 128))

    # --- single small tile (B=8): TB=8, grid=1, single in-kernel chunk ---
    key, kx = jax.random.split(key)
    x = jax.random.normal(kx, (8, in_dim), jnp.float32)
    out = jax.block_until_ready(classifier_forward(x, params))
    assert out.shape == (8, out_dim), out.shape
    _check(out, x, params, "B=8")

    # --- multi-tile + padding path (B=20, block_b=8 -> TB=8, grid=3, pad to 24) ---
    key, kx2 = jax.random.split(key)
    x2 = jax.random.normal(kx2, (20, in_dim), jnp.float32)
    out2 = jax.block_until_ready(classifier_forward(x2, params, block_b=8))
    assert out2.shape == (20, out_dim), out2.shape
    _check(out2, x2, params, "B=20 tiled")

    # --- large tile with in-kernel sub-chunk loop (B=600 -> TB=768, SUB=256, 3 chunks) ---
    key, kx3 = jax.random.split(key)
    x3 = jax.random.normal(kx3, (600, in_dim), jnp.float32)
    out3 = jax.block_until_ready(classifier_forward(x3, params))
    assert out3.shape == (600, out_dim), out3.shape
    _check(out3, x3, params, "B=600 chunked")

    print("KERNEL_OK")
</pallas_src>

<mosaic_0001>
module attributes {stable_mosaic.version = 11 : i64} {
  func.func @_mlp_kernel(%arg0: i32, %arg1: memref<8x32xf32, #tpu.memory_space<vmem>>, %arg2: memref<32x64xbf16, #tpu.memory_space<vmem>>, %arg3: memref<1x64xf32, #tpu.memory_space<vmem>>, %arg4: memref<64x128xbf16, #tpu.memory_space<vmem>>, %arg5: memref<1x128xf32, #tpu.memory_space<vmem>>, %arg6: memref<128x10xbf16, #tpu.memory_space<vmem>>, %arg7: memref<1x10xf32, #tpu.memory_space<vmem>>, %arg8: memref<8x10xf32, #tpu.memory_space<vmem>>) attributes {dimension_semantics = [#tpu.dimension_semantics<parallel>], iteration_bounds = array<i64: 1>, scalar_prefetch = 0 : i64, scratch_operands = 0 : i64, tpu.core_type = #tpu.core_type<tc>, window_params = [{transform_indices = @transform_0, window_bounds = array<i64: 8, 32>}, {pipeline_mode = #tpu.pipeline_mode<synchronous>, transform_indices = @transform_1, window_bounds = array<i64: 32, 64>}, {pipeline_mode = #tpu.pipeline_mode<synchronous>, transform_indices = @transform_2, window_bounds = array<i64: 1, 64>}, {pipeline_mode = #tpu.pipeline_mode<synchronous>, transform_indices = @transform_3, window_bounds = array<i64: 64, 128>}, {pipeline_mode = #tpu.pipeline_mode<synchronous>, transform_indices = @transform_4, window_bounds = array<i64: 1, 128>}, {pipeline_mode = #tpu.pipeline_mode<synchronous>, transform_indices = @transform_5, window_bounds = array<i64: 128, 10>}, {pipeline_mode = #tpu.pipeline_mode<synchronous>, transform_indices = @transform_6, window_bounds = array<i64: 1, 10>}, {transform_indices = @transform_7, window_bounds = array<i64: 8, 10>}]} {
    %c0 = arith.constant 0 : index
    %c0_0 = arith.constant 0 : index
    %0 = vector.load %arg2[%c0, %c0_0] : memref<32x64xbf16, #tpu.memory_space<vmem>>, vector<32x64xbf16>
    %c0_1 = arith.constant 0 : index
    %c0_2 = arith.constant 0 : index
    %1 = vector.load %arg3[%c0_1, %c0_2] : memref<1x64xf32, #tpu.memory_space<vmem>>, vector<1x64xf32>
    %c0_3 = arith.constant 0 : index
    %c0_4 = arith.constant 0 : index
    %2 = vector.load %arg4[%c0_3, %c0_4] : memref<64x128xbf16, #tpu.memory_space<vmem>>, vector<64x128xbf16>
    %c0_5 = arith.constant 0 : index
    %c0_6 = arith.constant 0 : index
    %3 = vector.load %arg5[%c0_5, %c0_6] : memref<1x128xf32, #tpu.memory_space<vmem>>, vector<1x128xf32>
    %c0_7 = arith.constant 0 : index
    %c0_8 = arith.constant 0 : index
    %4 = vector.load %arg6[%c0_7, %c0_8] : memref<128x10xbf16, #tpu.memory_space<vmem>>, vector<128x10xbf16>
    %c0_9 = arith.constant 0 : index
    %c0_10 = arith.constant 0 : index
    %5 = vector.load %arg7[%c0_9, %c0_10] : memref<1x10xf32, #tpu.memory_space<vmem>>, vector<1x10xf32>
    %c0_11 = arith.constant 0 : index
    %c0_12 = arith.constant 0 : index
    %6 = vector.load %arg1[%c0_11, %c0_12] : memref<8x32xf32, #tpu.memory_space<vmem>>, vector<8x32xf32>
    %7 = arith.truncf %6 : vector<8x32xf32> to vector<8x32xbf16>
    %cst = arith.constant dense<0.000000e+00> : vector<8x64xf32>
    %8 = tpu.matmul %7, %0, %cst {dimension_numbers = #tpu.dot_dimension_numbers<[1], [0], [0], [1], [0, 0, 1, 1], [], []>} : vector<8x32xbf16>, vector<32x64xbf16>, vector<8x64xf32> -> vector<8x64xf32>
    %9 = vector.broadcast %1 : vector<1x64xf32> to vector<8x64xf32>
    %10 = arith.addf %8, %9 : vector<8x64xf32>
    %cst_13 = arith.constant 0.000000e+00 : f32
    %11 = vector.broadcast %cst_13 : f32 to vector<8x64xf32>
    %12 = arith.maximumf %10, %11 : vector<8x64xf32>
    %13 = arith.truncf %12 : vector<8x64xf32> to vector<8x64xbf16>
    %cst_14 = arith.constant dense<0.000000e+00> : vector<8x128xf32>
    %14 = tpu.matmul %13, %2, %cst_14 {dimension_numbers = #tpu.dot_dimension_numbers<[1], [0], [0], [1], [0, 0, 1, 1], [], []>} : vector<8x64xbf16>, vector<64x128xbf16>, vector<8x128xf32> -> vector<8x128xf32>
    %15 = vector.broadcast %3 : vector<1x128xf32> to vector<8x128xf32>
    %16 = arith.addf %14, %15 : vector<8x128xf32>
    %cst_15 = arith.constant 0.000000e+00 : f32
    %17 = vector.broadcast %cst_15 : f32 to vector<8x128xf32>
    %18 = arith.maximumf %16, %17 : vector<8x128xf32>
    %19 = arith.truncf %18 : vector<8x128xf32> to vector<8x128xbf16>
    %cst_16 = arith.constant dense<0.000000e+00> : vector<8x10xf32>
    %20 = tpu.matmul %19, %4, %cst_16 {dimension_numbers = #tpu.dot_dimension_numbers<[1], [0], [0], [1], [0, 0, 1, 1], [], []>} : vector<8x128xbf16>, vector<128x10xbf16>, vector<8x10xf32> -> vector<8x10xf32>
    %21 = vector.broadcast %5 : vector<1x10xf32> to vector<8x10xf32>
    %22 = arith.addf %20, %21 : vector<8x10xf32>
    %c0_17 = arith.constant 0 : index
    %c0_18 = arith.constant 0 : index
    %23 = vector.load %arg8[%c0_17, %c0_18] : memref<8x10xf32, #tpu.memory_space<vmem>>, vector<8x10xf32>
    tpu.vector_store %arg8[%c0_17, %c0_18], %22 {strides = array<i32>} : memref<8x10xf32, #tpu.memory_space<vmem>>, vector<8x10xf32>,
    return
  }
  func.func @transform_0(%arg0: i32) -> (i32, i32) {
    %c0_i32 = arith.constant 0 : i32
    %c0_i32_0 = arith.constant 0 : i32
    return %arg0, %c0_i32 : i32, i32
  }
  func.func @transform_1(%arg0: i32) -> (i32, i32) {
    %c0_i32 = arith.constant 0 : i32
    %c0_i32_0 = arith.constant 0 : i32
    %c0_i32_1 = arith.constant 0 : i32
    return %c0_i32, %c0_i32_0 : i32, i32
  }
  func.func @transform_2(%arg0: i32) -> (i32, i32) {
    %c0_i32 = arith.constant 0 : i32
    %c0_i32_0 = arith.constant 0 : i32
    %c0_i32_1 = arith.constant 0 : i32
    return %c0_i32, %c0_i32_0 : i32, i32
  }
  func.func @transform_3(%arg0: i32) -> (i32, i32) {
    %c0_i32 = arith.constant 0 : i32
    %c0_i32_0 = arith.constant 0 : i32
    %c0_i32_1 = arith.constant 0 : i32
    return %c0_i32, %c0_i32_0 : i32, i32
  }
  func.func @transform_4(%arg0: i32) -> (i32, i32) {
    %c0_i32 = arith.constant 0 : i32
    %c0_i32_0 = arith.constant 0 : i32
    %c0_i32_1 = arith.constant 0 : i32
    return %c0_i32, %c0_i32_0 : i32, i32
  }
  func.func @transform_5(%arg0: i32) -> (i32, i32) {
    %c0_i32 = arith.constant 0 : i32
    %c0_i32_0 = arith.constant 0 : i32
    %c0_i32_1 = arith.constant 0 : i32
    return %c0_i32, %c0_i32_0 : i32, i32
  }
  func.func @transform_6(%arg0: i32) -> (i32, i32) {
    %c0_i32 = arith.constant 0 : i32
    %c0_i32_0 = arith.constant 0 : i32
    %c0_i32_1 = arith.constant 0 : i32
    return %c0_i32, %c0_i32_0 : i32, i32
  }
  func.func @transform_7(%arg0: i32) -> (i32, i32) {
    %c0_i32 = arith.constant 0 : i32
    %c0_i32_0 = arith.constant 0 : i32
    return %arg0, %c0_i32 : i32, i32
  }
}

</mosaic_0001>

<bundles_post_ra>
// kernel: classifier_forward.1
= control target key start
LH: loop header
LB: loop body
LE: loop exit
PB: predicated region body
PF: predicated region fallthrough
CT: control target
= control target key end

     0   :  { %s423_s0 = inlined_call_operand.vmem [shape: f32[8,32], index: 0, kind: input, shape index: {}]   ;;  %s424_s1 = inlined_call_operand.vmem [shape: bf16[32,64], index: 1, kind: input, shape index: {}]   ;;  %s425_s2 = inlined_call_operand.vmem [shape: f32[1,64], index: 2, kind: input, shape index: {}]   ;;  %s426_s3 = inlined_call_operand.vmem [shape: bf16[64,128], index: 3, kind: input, shape index: {}]   ;;  %s427_s4 = inlined_call_operand.vmem [shape: f32[1,128], index: 4, kind: input, shape index: {}]   ;;  %s428_s5 = inlined_call_operand.vmem [shape: bf16[128,10], index: 5, kind: input, shape index: {}]   ;;  %s429_s6 = inlined_call_operand.vmem [shape: f32[1,10], index: 6, kind: input, shape index: {}]   ;;  %s430_s7 = inlined_call_operand.hbm [shape: f32[8,10], index: 7, kind: output, shape index: {}]  }
   0x1   :  { %v282_v0 = vld [vmem:[%s424_s1 + $0x8] sm:$0xff]  ;;  %v281_v1 = vld [vmem:[%s424_s1] sm:$0xff]  ;;  %v286_v2 = vld [vmem:[%s426_s3 + $0x18] sm:$0xff] }
   0x2   :  { %86 = vmatpush.bf16.msra.mxu0 %v282_v0  ;;  %v59_v3 = vld [vmem:[%s423_s0] sm:$0xff]  ;;  %130 = vmatpush.bf16.msra.mxu1 %v286_v2  ;;  %v285_v4 = vld [vmem:[%s426_s3 + $0x10] sm:$0xff] }
   0x3   :  { %12 = vsyncpa [#allocation3], 0  ;;  %v60_v5 = vpack.c.bf16 %v59_v3, %v59_v3  ;;  %vm76_vm0 = vcmask 261120   ;;  %v284_v6 = vld [vmem:[%s426_s3 + $0x8] sm:$0xff]  ;;  %v283_v7 = vld [vmem:[%s426_s3] sm:$0xff]  ;;  %vm122_vm1 = vcmask 523264  }
   0x4   :  { %v294_v8 = vld [vmem:[%s428_s5 + $0x38] sm:$0xff]  ;;  %v293_v9 = vld [vmem:[%s428_s5 + $0x30] sm:$0xff]  ;;  %v292_v10 = vld [vmem:[%s428_s5 + $0x28] sm:$0xff]  ;;  %s325_s10 = smov [#allocation2]   ;;  %vm205_vm2 = vcmask 80896  }
   0x5   :  { %192 = vmatpush.bf16.msra.mxu2 %v294_v8  ;;  %v291_v11 = vld [vmem:[%s428_s5 + $0x20] sm:$0xff]  ;;  %v290_v12 = vld [vmem:[%s428_s5 + $0x18] sm:$0xff]  ;;  %v289_v13 = vld [vmem:[%s428_s5 + $0x10] sm:$0xff]  ;;  %s212_s1 = sshll.u32 %s325_s10, 4  ;;  %s213_s1 = int_to_ptr.vmem [resolvable:$true] %s212_s1 }
   0x6   :  { %87 = vmatpush.bf16.msra.mxu0 %v281_v1  ;;  %131 = vmatpush.bf16.msra.mxu1 %v285_v4  ;;  %v296_v14 = vld [vmem:[%s425_s2] ss:$0 sm:$0xff]  ;;  %v288_v20 = vld [vmem:[%s428_s5 + $0x8] sm:$0xff] }
   0x7   :  { %v287_v21 = vld [vmem:[%s428_s5] sm:$0xff]  ;;  %s214_s5 = sshll.u32 %s430_s7, 4  ;;  %s215_s5 = int_to_ptr.hbm [resolvable:$true] %s214_s5 }
   0x8   :  { %v297_v22 = vld [vmem:[%s427_s4] ss:$0 sm:$0xff] }
   0x9   :  { %231 = vmatmul.msk.bf16.vlgmr.msra.gmra.mxu0 %vm76_vm0, %v60_v5  ;;  %193 = vmatpush.bf16.msra.mxu2 %v293_v9  ;;  %v298_v28 = vld [vmem:[%s429_s6] ss:$0 sm:$0xff] }
   0xa   :  { %132 = vmatpush.bf16.msra.mxu1 %v284_v6 }
   0xd   :  { %194 = vmatpush.bf16.msra.mxu2 %v292_v10 }
   0xe   :  { %133 = vmatpush.bf16.msra.mxu1 %v283_v7 }
  0x11   :  { %195 = vmatpush.bf16.msra.mxu2 %v291_v11 }
  0x15   :  { %196 = vmatpush.bf16.msra.mxu2 %v290_v12 }
  0x19   :  { %197 = vmatpush.bf16.msra.mxu2 %v289_v13 }
  0x1d   :  { %198 = vmatpush.bf16.msra.mxu2 %v288_v20 }
  0x21   :  { %199 = vmatpush.bf16.msra.mxu2 %v287_v21 }
  0x86   :  { %v89_v15 = vpop.f32.mrf.mxu0 }
  0x87   :  { %v90_v16 = vadd.f32 %v296_v14, %v89_v15 }
  0x89   :  { %v93_v17 = vmax.f32 %v90_v16, 0.0 }
  0x8b   :  { %v94_v18 = vpack.c.bf16 %v93_v17, %v93_v17 }
  0x8d   :  { %248 = vmatmul.msk.bf16.vlgmr.msra.gmra.mxu1 %vm122_vm1, %v94_v18 }
  0x8e   :  { %v91_v19 = vpop.f32.mrf.mxu0 }
 0x10a   :  { %v135_v23 = vpop.f32.mrf.mxu1 }
 0x10b   :  { %v136_v24 = vadd.f32 %v297_v22, %v135_v23 }
 0x10d   :  { %v139_v25 = vmax.f32 %v136_v24, 0.0 }
 0x10f   :  { %v140_v26 = vpack.c.bf16 %v139_v25, %v139_v25 }
 0x111   :  { %200 = vmatmul.bf16.vlgmr.msra.gmra.mxu2 %v140_v26 }
 0x112   :  { %v137_v27 = vpop.f32.mrf.mxu1 }
 0x194   :  { %v201_v29 = vpop.f32.mrf.mxu2 }
 0x195   :  { %v202_v30 = vadd.f32 %v298_v28, %v201_v29 }
 0x197   :  { %206 = vst.msk [vmem:[#allocation2] sm:$0xff] %vm205_vm2, %v202_v30 }
 0x198   :  { %217 = dma.vmem_to_hbm [thread:$0]  %s213_s1, 128, %s215_s5, [#allocation3]  }
 0x19c   :  { %v203_v31 = vpop.f32.mrf.mxu2 }
 0x19d   :  { %323 = dma.done.wait [#allocation3], 128  }
 0x19e   :  { %324 = vsyncadd [#allocation3], 4294967168 }
 0x19f   :  { %222 = vsyncpa [#allocation3], 1 }

</bundles_post_ra>
